<compile_context>
chip_gen: v5e
topology: v5e:2x2
jax: 0.10.0
libtpu: 0.0.40
codegen_flags: <defaults>
</compile_context>

<pallas_src>
import functools

import jax
import jax.numpy as jnp
from jax.experimental import pallas as pl
from jax.experimental.pallas import tpu as pltpu


# ----------------------------------------------------------------------------- kernel


def mlp_kernel(x_ref, gate_ref, up_ref, down_ref, o_ref, acc_ref):
    """One (row-tile, I-chunk) step of the fused MLP.

    x_ref:    (tm, H)   input rows (block index constant across k -> stays resident)
    gate_ref: (H, ti)   gate_proj.T I-chunk   (native (K, N) layout)
    up_ref:   (H, ti)   up_proj.T I-chunk
    down_ref: (ti, H)   down_proj.T I-chunk
    o_ref:    (tm, H)   output rows (written once, at the last k step)
    acc_ref:  (tm, H)   f32 accumulator over the I (k) grid axis
    """
    k = pl.program_id(1)

    @pl.when(k == 0)
    def _():
        acc_ref[...] = jnp.zeros_like(acc_ref)

    x = x_ref[...]
    # Gate / up projections for this I-chunk: (tm, ti), f32 accumulation on the MXU.
    gate = jnp.dot(x, gate_ref[...], preferred_element_type=jnp.float32)
    up = jnp.dot(x, up_ref[...], preferred_element_type=jnp.float32)
    # act_fn = SiLU (the standard LLaMA MLP activation).
    # TODO(synk): other torch act_fn choices would need their own jnp mapping here.
    act = gate * jax.nn.sigmoid(gate)
    h = (act * up).astype(x_ref.dtype)
    # Partial down-projection for this I-chunk, accumulated in f32.
    acc_ref[...] += jnp.dot(h, down_ref[...], preferred_element_type=jnp.float32)

    @pl.when(k == pl.num_programs(1) - 1)
    def _():
        o_ref[...] = acc_ref[...].astype(o_ref.dtype)


# ------------------------------------------------------------------- tiling / weights


def _vmem_capacity_bytes():
    """Physical per-core VMEM, with a conservative (v7x) fallback."""
    try:
        info = pltpu.get_tpu_info()
        for name in ("vmem_capacity_bytes", "vmem_bytes", "vmem_size_bytes"):
            cap = getattr(info, name, None)
            if cap:
                return int(cap)
    except Exception:
        pass
    return 64 * 1024 * 1024


def _select_tiles(H, I, itemsize, vmem_cap, m_hint=8192):
    """Pick (tm, ti) = largest pair whose pipelined VMEM footprint fits the budget."""
    budget = int(vmem_cap * 0.85)

    def footprint(tm, ti):
        return (
            2 * itemsize * (2 * tm * H + 3 * ti * H)  # double-buffered x/out + 3 weight blocks
            + 4 * tm * H                              # f32 accumulator scratch
            + tm * ti * (8 + itemsize)                # f32 gate/up temporaries + cast h
        )

    cand = (1024, 512, 256, 128)
    tm_cands = [t for t in cand if t <= m_hint] or [128]
    if I < 128:
        ti_cands = [I]                                # full-I block (legal: equals full dim)
    else:
        ti_cands = [t for t in cand if t <= I] or [128]

    # Prefer: larger min(tm, ti), then larger product, then larger tm (HBM intensity).
    pairs = sorted(((tm, ti) for tm in tm_cands for ti in ti_cands),
                   key=lambda p: (min(p), p[0] * p[1], p[0]))
    for tm, ti in reversed(pairs):
        if footprint(tm, ti) <= budget:
            return tm, ti
    return tm_cands[-1], ti_cands[-1]


def prepare_mlp_weights(gate_proj, up_proj, down_proj, compute_dtype=None):
    """One-time weight prep: optional dtype cast, transpose to native (K, N), pad I.

    gate_proj/up_proj: (I, H), down_proj: (H, I)  (PyTorch layouts).
    Returns a params dict consumed by mlp_forward.
    """
    gate_proj = jnp.asarray(gate_proj)
    up_proj = jnp.asarray(up_proj)
    down_proj = jnp.asarray(down_proj)
    if compute_dtype is not None:
        gate_proj = gate_proj.astype(compute_dtype)
        up_proj = up_proj.astype(compute_dtype)
        down_proj = down_proj.astype(compute_dtype)

    I, H = gate_proj.shape
    itemsize = jnp.dtype(gate_proj.dtype).itemsize
    cap = _vmem_capacity_bytes()
    tm, ti = _select_tiles(H, I, itemsize, cap)

    i_pad = pl.cdiv(I, ti) * ti
    pad = i_pad - I

    gate_t = gate_proj.T          # (H, I)
    up_t = up_proj.T              # (H, I)
    down_t = down_proj.T          # (I, H)
    if pad:
        gate_t = jnp.pad(gate_t, ((0, 0), (0, pad)))
        up_t = jnp.pad(up_t, ((0, 0), (0, pad)))
        down_t = jnp.pad(down_t, ((0, pad), (0, 0)))

    return {
        "gate_t": gate_t,
        "up_t": up_t,
        "down_t": down_t,
        "tm": tm,
        "ti": ti,
        "hidden": H,
        "vmem_limit": int(cap * 0.90),
    }


# --------------------------------------------------------------------------- forward


@functools.partial(jax.jit, static_argnames=("tm", "ti", "vmem_limit_bytes"))
def _mlp_call(x2d, gate_t, up_t, down_t, *, tm, ti, vmem_limit_bytes):
    M, H = x2d.shape
    i_pad = gate_t.shape[1]
    n_row_tiles = pl.cdiv(M, tm)
    grid = (n_row_tiles, i_pad // ti)
    itemsize = jnp.dtype(x2d.dtype).itemsize

    cost = pl.CostEstimate(
        flops=6 * M * H * i_pad,
        transcendentals=M * i_pad,
        bytes_accessed=itemsize * (3 * H * i_pad * n_row_tiles + 2 * M * H),
    )

    return pl.pallas_call(
        mlp_kernel,
        out_shape=jax.ShapeDtypeStruct((M, H), x2d.dtype),
        grid_spec=pltpu.PrefetchScalarGridSpec(
            num_scalar_prefetch=0,
            grid=grid,
            in_specs=[
                pl.BlockSpec((tm, H), lambda i, k: (i, 0)),   # x rows (resident over k)
                pl.BlockSpec((H, ti), lambda i, k: (0, k)),   # gate_proj.T I-chunk
                pl.BlockSpec((H, ti), lambda i, k: (0, k)),   # up_proj.T I-chunk
                pl.BlockSpec((ti, H), lambda i, k: (k, 0)),   # down_proj.T I-chunk
            ],
            out_specs=pl.BlockSpec((tm, H), lambda i, k: (i, 0)),
            scratch_shapes=[pltpu.VMEM((tm, H), jnp.float32)],  # f32 accumulator
        ),
        compiler_params=pltpu.CompilerParams(
            dimension_semantics=("parallel", "arbitrary"),
            vmem_limit_bytes=vmem_limit_bytes,
        ),
        cost_estimate=cost,
    )(x2d, gate_t, up_t, down_t)


def mlp_forward(x, params):
    """x: (..., H).  Returns the MLP output with the same leading shape."""
    gate_t = params["gate_t"]
    H = params["hidden"]
    compute_dtype = gate_t.dtype

    orig_shape = x.shape
    x2d = jnp.asarray(x).reshape(-1, H).astype(compute_dtype)
    M = x2d.shape[0]

    tm = params["tm"]
    if M < tm:
        tm = M  # single full-row block (legal: block dim equals the full array dim)
    # TODO(synk): for decode-sized M on v7x, split the I reduction across the two
    # TensorCores (partial (M, H) per core + add) instead of splitting rows.

    out2d = _mlp_call(
        x2d, gate_t, params["up_t"], params["down_t"],
        tm=tm, ti=params["ti"], vmem_limit_bytes=params["vmem_limit"],
    )
    return out2d.reshape(orig_shape)


# ------------------------------------------------------------------------- reference


def reference_mlp(x, gate_proj, up_proj, down_proj):
    gate_out = jnp.matmul(x, gate_proj.T)
    up_out = jnp.matmul(x, up_proj.T)
    activated = gate_out * jax.nn.sigmoid(gate_out)   # SiLU
    return jnp.matmul(activated * up_out, down_proj.T)


if __name__ == "__main__":
    # Small shapes consistent with the module's forward:
    #   x: (batch=2, seq=8, hidden=32), intermediate=64
    B, S, H, I = 2, 8, 32, 64

    key = jax.random.PRNGKey(0)
    kx, kg, ku, kd = jax.random.split(key, 4)

    x = jax.random.normal(kx, (B, S, H), dtype=jnp.float32)
    gate_proj = jax.random.normal(kg, (I, H), dtype=jnp.float32) * 0.05
    up_proj = jax.random.normal(ku, (I, H), dtype=jnp.float32) * 0.05
    down_proj = jax.random.normal(kd, (H, I), dtype=jnp.float32) * 0.05

    # One-time weight prep (transpose to native MXU layout, pad I, pick tiles).
    # For production use compute_dtype=jnp.bfloat16; kept f32 here so the numeric
    # check against the f32 reference is exact-ish.
    params = prepare_mlp_weights(gate_proj, up_proj, down_proj, compute_dtype=None)

    out = jax.block_until_ready(mlp_forward(x, params))

    ref = reference_mlp(x, gate_proj, up_proj, down_proj)
    assert out.shape == (B, S, H)
    assert jnp.allclose(out, ref, atol=1e-4, rtol=1e-4), "mismatch vs reference"

    print("KERNEL_OK")
</pallas_src>

<mosaic_0001>
module attributes {stable_mosaic.version = 11 : i64} {
  func.func @mlp_kernel(%arg0: i32, %arg1: i32, %arg2: memref<16x32xf32, #tpu.memory_space<vmem>>, %arg3: memref<32x64xf32, #tpu.memory_space<vmem>>, %arg4: memref<32x64xf32, #tpu.memory_space<vmem>>, %arg5: memref<64x32xf32, #tpu.memory_space<vmem>>, %arg6: memref<16x32xf32, #tpu.memory_space<vmem>>, %arg7: memref<16x32xf32, #tpu.memory_space<vmem>>) attributes {dimension_semantics = [#tpu.dimension_semantics<parallel>, #tpu.dimension_semantics<arbitrary>], iteration_bounds = array<i64: 1, 1>, scalar_prefetch = 0 : i64, scratch_operands = 1 : i64, tpu.core_type = #tpu.core_type<tc>, window_params = [{transform_indices = @transform_0, window_bounds = array<i64: 16, 32>}, {transform_indices = @transform_1, window_bounds = array<i64: 32, 64>}, {transform_indices = @transform_2, window_bounds = array<i64: 32, 64>}, {transform_indices = @transform_3, window_bounds = array<i64: 64, 32>}, {transform_indices = @transform_4, window_bounds = array<i64: 16, 32>}]} {
    %c0_i32 = arith.constant 0 : i32
    %0 = arith.cmpi eq, %arg1, %c0_i32 : i32
    %1 = arith.extui %0 : i1 to i32
    %c0_i32_0 = arith.constant 0 : i32
    %2 = arith.cmpi ne, %1, %c0_i32_0 : i32
    scf.if %2 {
      %cst_17 = arith.constant 0.000000e+00 : f32
      %23 = vector.broadcast %cst_17 : f32 to vector<16x32xf32>
      %c0_18 = arith.constant 0 : index
      %c0_19 = arith.constant 0 : index
      %24 = vector.load %arg7[%c0_18, %c0_19] : memref<16x32xf32, #tpu.memory_space<vmem>>, vector<16x32xf32>
      tpu.vector_store %arg7[%c0_18, %c0_19], %23 {strides = array<i32>} : memref<16x32xf32, #tpu.memory_space<vmem>>, vector<16x32xf32>,
    } else {
    }
    %c0 = arith.constant 0 : index
    %c0_1 = arith.constant 0 : index
    %3 = vector.load %arg2[%c0, %c0_1] : memref<16x32xf32, #tpu.memory_space<vmem>>, vector<16x32xf32>
    %c0_2 = arith.constant 0 : index
    %c0_3 = arith.constant 0 : index
    %4 = vector.load %arg3[%c0_2, %c0_3] : memref<32x64xf32, #tpu.memory_space<vmem>>, vector<32x64xf32>
    %cst = arith.constant dense<0.000000e+00> : vector<16x64xf32>
    %5 = tpu.matmul %3, %4, %cst {dimension_numbers = #tpu.dot_dimension_numbers<[1], [0], [0], [1], [0, 0, 1, 1], [], []>} : vector<16x32xf32>, vector<32x64xf32>, vector<16x64xf32> -> vector<16x64xf32>
    %c0_4 = arith.constant 0 : index
    %c0_5 = arith.constant 0 : index
    %6 = vector.load %arg4[%c0_4, %c0_5] : memref<32x64xf32, #tpu.memory_space<vmem>>, vector<32x64xf32>
    %cst_6 = arith.constant dense<0.000000e+00> : vector<16x64xf32>
    %7 = tpu.matmul %3, %6, %cst_6 {dimension_numbers = #tpu.dot_dimension_numbers<[1], [0], [0], [1], [0, 0, 1, 1], [], []>} : vector<16x32xf32>, vector<32x64xf32>, vector<16x64xf32> -> vector<16x64xf32>
    %8 = arith.negf %5 : vector<16x64xf32>
    %9 = math.exp %8 : vector<16x64xf32>
    %cst_7 = arith.constant 1.000000e+00 : f32
    %10 = vector.broadcast %cst_7 : f32 to vector<16x64xf32>
    %11 = arith.addf %10, %9 : vector<16x64xf32>
    %12 = arith.divf %10, %11 : vector<16x64xf32>
    %13 = arith.mulf %5, %12 : vector<16x64xf32>
    %14 = arith.mulf %13, %7 : vector<16x64xf32>
    %c0_8 = arith.constant 0 : index
    %c0_9 = arith.constant 0 : index
    %15 = vector.load %arg7[%c0_8, %c0_9] : memref<16x32xf32, #tpu.memory_space<vmem>>, vector<16x32xf32>
    %c0_10 = arith.constant 0 : index
    %c0_11 = arith.constant 0 : index
    %16 = vector.load %arg5[%c0_10, %c0_11] : memref<64x32xf32, #tpu.memory_space<vmem>>, vector<64x32xf32>
    %cst_12 = arith.constant dense<0.000000e+00> : vector<16x32xf32>
    %17 = tpu.matmul %14, %16, %cst_12 {dimension_numbers = #tpu.dot_dimension_numbers<[1], [0], [0], [1], [0, 0, 1, 1], [], []>} : vector<16x64xf32>, vector<64x32xf32>, vector<16x32xf32> -> vector<16x32xf32>
    %18 = arith.addf %15, %17 : vector<16x32xf32>
    %c0_13 = arith.constant 0 : index
    %c0_14 = arith.constant 0 : index
    %19 = vector.load %arg7[%c0_13, %c0_14] : memref<16x32xf32, #tpu.memory_space<vmem>>, vector<16x32xf32>
    tpu.vector_store %arg7[%c0_13, %c0_14], %18 {strides = array<i32>} : memref<16x32xf32, #tpu.memory_space<vmem>>, vector<16x32xf32>,
    %c0_i32_15 = arith.constant 0 : i32
    %20 = arith.cmpi eq, %arg1, %c0_i32_15 : i32
    %21 = arith.extui %20 : i1 to i32
    %c0_i32_16 = arith.constant 0 : i32
    %22 = arith.cmpi ne, %21, %c0_i32_16 : i32
    scf.if %22 {
      %c0_17 = arith.constant 0 : index
      %c0_18 = arith.constant 0 : index
      %23 = vector.load %arg7[%c0_17, %c0_18] : memref<16x32xf32, #tpu.memory_space<vmem>>, vector<16x32xf32>
      %c0_19 = arith.constant 0 : index
      %c0_20 = arith.constant 0 : index
      %24 = vector.load %arg6[%c0_19, %c0_20] : memref<16x32xf32, #tpu.memory_space<vmem>>, vector<16x32xf32>
      tpu.vector_store %arg6[%c0_19, %c0_20], %23 {strides = array<i32>} : memref<16x32xf32, #tpu.memory_space<vmem>>, vector<16x32xf32>,
    } else {
    }
    return
  }
  func.func @transform_0(%arg0: i32, %arg1: i32) -> (i32, i32) {
    %c0_i32 = arith.constant 0 : i32
    %c0_i32_0 = arith.constant 0 : i32
    return %arg0, %c0_i32 : i32, i32
  }
  func.func @transform_1(%arg0: i32, %arg1: i32) -> (i32, i32) {
    %c0_i32 = arith.constant 0 : i32
    %c0_i32_0 = arith.constant 0 : i32
    return %c0_i32, %arg1 : i32, i32
  }
  func.func @transform_2(%arg0: i32, %arg1: i32) -> (i32, i32) {
    %c0_i32 = arith.constant 0 : i32
    %c0_i32_0 = arith.constant 0 : i32
    return %c0_i32, %arg1 : i32, i32
  }
  func.func @transform_3(%arg0: i32, %arg1: i32) -> (i32, i32) {
    %c0_i32 = arith.constant 0 : i32
    %c0_i32_0 = arith.constant 0 : i32
    return %arg1, %c0_i32 : i32, i32
  }
  func.func @transform_4(%arg0: i32, %arg1: i32) -> (i32, i32) {
    %c0_i32 = arith.constant 0 : i32
    %c0_i32_0 = arith.constant 0 : i32
    return %arg0, %c0_i32 : i32, i32
  }
}

</mosaic_0001>

<bundles_post_ra>
// kernel: _mlp_call.1
= control target key start
LH: loop header
LB: loop body
LE: loop exit
PB: predicated region body
PF: predicated region fallthrough
CT: control target
= control target key end

     0   :  { %s351_s0 = inlined_call_operand.vmem [shape: f32[16,32], index: 0, kind: input, shape index: {}]   ;;  %s352_s1 = inlined_call_operand.vmem [shape: f32[32,64], index: 1, kind: input, shape index: {}]   ;;  %s353_s2 = inlined_call_operand.vmem [shape: f32[32,64], index: 2, kind: input, shape index: {}]   ;;  %s354_s3 = inlined_call_operand.vmem [shape: f32[64,32], index: 3, kind: input, shape index: {}]   ;;  %s355_s4 = inlined_call_operand.hbm [shape: f32[16,32], index: 4, kind: output, shape index: {}]  }
   0x1   :  { %v30_v0 = vld [vmem:[%s352_s1 + $0x18] sm:$0xff]  ;;  %v29_v1 = vld [vmem:[%s352_s1 + $0x10] sm:$0xff]  ;;  %v28_v2 = vld [vmem:[%s352_s1 + $0x8] sm:$0xff] }
   0x2   :  { %50 = vmatpush.msra.mxu0 %v30_v0  ;;  %v64_v3 = vld [vmem:[%s353_s2 + $0x18] sm:$0xff]  ;;  %v63_v4 = vld [vmem:[%s353_s2 + $0x10] sm:$0xff] }
   0x3   :  { %77 = vmatpush.msra.mxu1 %v64_v3 }
   0x4   :  { %51 = vmatpush.msra.mxu0 %v29_v1 }
   0x5   :  { %9 = vsyncpa [#allocation4], 0  ;;  %v27_v5 = vld [vmem:[%s352_s1] sm:$0xff]  ;;  %v62_v6 = vld [vmem:[%s353_s2 + $0x8] sm:$0xff]  ;;  %vm22_vm0 = vcmask 261120   ;;  %78 = vmatpush.msra.mxu1 %v63_v4  ;;  %v253_v24 = vmov 0.0  }
   0x6   :  { %52 = vmatpush.msra.mxu0 %v28_v2  ;;  %v25_v7 = vld [vmem:[%s351_s0] sm:$0xff]  ;;  %v26_v9 = vld [vmem:[%s351_s0 + $0x8] sm:$0xff]  ;;  %v139_v10 = vld [vmem:[%s354_s3 + $0x38] sm:$0xff]  ;;  %23 = vst.msk [vmem:[#allocation2] sm:$0xff] %vm22_vm0, %v253_v24  ;;  %vm140_vm5 = vcmask 523264   ;;  %s187_s25 = sshll.u32 %s355_s4, 4  ;;  %s188_s25 = int_to_ptr.hbm [resolvable:$true] %s187_s25 }
   0x7   :  { %v61_v8 = vld [vmem:[%s353_s2] sm:$0xff]  ;;  %79 = vmatpush.msra.mxu1 %v62_v6  ;;  %155 = vmatpush.msra.mxu2 %v139_v10  ;;  %v138_v11 = vld [vmem:[%s354_s3 + $0x30] sm:$0xff]  ;;  %v137_v12 = vld [vmem:[%s354_s3 + $0x28] sm:$0xff]  ;;  %24 = vst.msk [vmem:[#allocation2 + $0x8] sm:$0xff] %vm22_vm0, %v253_v24  ;;  %s255_s26 = smov 128   ;;  %s256_s27 = smov 8  }
   0x8   :  { %53 = vmatpush.msra.mxu0 %v27_v5  ;;  %207 = vmatpush.msra.mxu3 %v139_v10  ;;  %v136_v13 = vld [vmem:[%s354_s3 + $0x20] sm:$0xff]  ;;  %v135_v14 = vld [vmem:[%s354_s3 + $0x18] sm:$0xff]  ;;  %v134_v15 = vld [vmem:[%s354_s3 + $0x10] sm:$0xff] }
   0x9   :  { %199 = vmatmul.msk.f32.vlgmr.msra.gmra.mxu0 %vm22_vm0, %v25_v7  ;;  %80 = vmatpush.msra.mxu1 %v61_v8  ;;  %v133_v16 = vld [vmem:[%s354_s3 + $0x8] sm:$0xff]  ;;  %v132_v17 = vld [vmem:[%s354_s3] sm:$0xff]  ;;  %s254_s3 = smov [#allocation3]  }
   0xa   :  { %201 = vmatmul.msk.f32.vlgmr.msra.gmra.mxu1 %vm22_vm0, %v25_v7  ;;  %156 = vmatpush.msra.mxu2 %v138_v11  ;;  %s185_s22 = sshll.u32 %s254_s3, 4  ;;  %s186_s22 = int_to_ptr.vmem [resolvable:$true] %s185_s22 }
   0xb   :  { %208 = vmatpush.msra.mxu3 %v138_v11 }
   0xc   :  { %157 = vmatpush.msra.mxu2 %v137_v12 }
   0xd   :  { %209 = vmatpush.msra.mxu3 %v137_v12  ;;  %v130_v53 = vld [vmem:[#allocation2] sm:$0xff] }
   0xe   :  { %158 = vmatpush.msra.mxu2 %v136_v13  ;;  %v131_v56 = vld [vmem:[#allocation2 + $0x8] sm:$0xff] }
   0xf   :  { %210 = vmatpush.msra.mxu3 %v136_v13 }
  0x10   :  { %159 = vmatpush.msra.mxu2 %v135_v14 }
  0x11   :  { %200 = vmatmul.msk.f32.gmra.mxu0 %vm22_vm0, %v26_v9  ;;  %211 = vmatpush.msra.mxu3 %v135_v14 }
  0x12   :  { %202 = vmatmul.msk.f32.gmra.mxu1 %vm22_vm0, %v26_v9  ;;  %160 = vmatpush.msra.mxu2 %v134_v15 }
  0x13   :  { %212 = vmatpush.msra.mxu3 %v134_v15 }
  0x14   :  { %161 = vmatpush.msra.mxu2 %v133_v16 }
  0x15   :  { %213 = vmatpush.msra.mxu3 %v133_v16 }
  0x16   :  { %162 = vmatpush.msra.mxu2 %v132_v17 }
  0x17   :  { %214 = vmatpush.msra.mxu3 %v132_v17 }
  0x86   :  { %v55_v18 = vpop.f32.mrf.mxu0 }
  0x87   :  { %v203_v19 = vmul.f32 -1.442695, %v55_v18  ;;  %v82_v36 = vpop.f32.mrf.mxu1 }
  0x89   :  { %219 = vpow2.f32 %v203_v19 }
  0x8e   :  { %v58_v20 = vpop.f32.mrf.mxu0 }
  0x8f   :  { %v220_v21 = vpop.eup %219  ;;  %v204_v22 = vmul.f32 -1.442695, %v58_v20  ;;  %v85_v50 = vpop.f32.mrf.mxu1 }
  0x90   :  { %v94_v23 = vadd.f32 1.0, %v220_v21 }
  0x91   :  { %221 = vpow2.f32 %v204_v22 }
  0x92   :  { %223 = vrcp.f32 %v94_v23  ;;  %v107_v30 = vand.u32 2147483648, %v94_v23  ;;  %v105_v32 = vand.u32 2147483647, %v94_v23  ;;  %vm101_vm2 = vweird.f32 %v94_v23 }
  0x94   :  { %v108_v35 = vor.u32 1.1754944e-38, %v107_v30  ;;  %vm106_vm4 = vcmp.eq.f32.partialorder %v105_v32, 8.507059e+37 }
  0x97   :  { %v222_v25 = vpop.eup %221 }
  0x98   :  { %v224_v26 = vpop.eup %223  ;;  %v95_v27 = vadd.f32 1.0, %v222_v25 }
  0x99   :  { %v97_v28 = vmul.f32 %v224_v26, %v94_v23  ;;  %vm102_vm1 = vweird.f32 %v224_v26 }
  0x9a   :  { %225 = vrcp.f32 %v95_v27  ;;  %vm103_vm3 = vmor %vm101_vm2, %vm102_vm1  ;;  %v122_v42 = vand.u32 2147483648, %v95_v27  ;;  %v120_v44 = vand.u32 2147483647, %v95_v27  ;;  %vm116_vm7 = vweird.f32 %v95_v27 }
  0x9b   :  { %v98_v29 = vsub.f32 1.0, %v97_v28 }
  0x9c   :  { %v123_v47 = vor.u32 1.1754944e-38, %v122_v42  ;;  %vm121_vm9 = vcmp.eq.f32.partialorder %v120_v44, 8.507059e+37 }
  0x9d   :  { %v99_v31 = vmul.f32 %v224_v26, %v98_v29 }
  0x9f   :  { %v100_v33 = vadd.f32 %v224_v26, %v99_v31 }
  0xa0   :  { %v226_v34 = vpop.eup %225 }
  0xa1   :  { %v104_v37 = vsel %vm103_vm3, %v224_v26, %v100_v33  ;;  %v112_v38 = vmul.f32 %v226_v34, %v95_v27  ;;  %vm117_vm6 = vweird.f32 %v226_v34 }
  0xa2   :  { %v109_v39 = vsel %vm106_vm4, %v108_v35, %v104_v37  ;;  %vm118_vm8 = vmor %vm116_vm7, %vm117_vm6 }
  0xa3   :  { %v126_v40 = vmul.f32 %v109_v39, %v55_v18  ;;  %v113_v41 = vsub.f32 1.0, %v112_v38 }
  0xa5   :  { %v114_v43 = vmul.f32 %v226_v34, %v113_v41  ;;  %v128_v45 = vmul.f32 %v126_v40, %v82_v36 }
  0xa7   :  { %v115_v46 = vadd.f32 %v226_v34, %v114_v43  ;;  %205 = vmatmul.msk.f32.vlgmr.msra.gmra.mxu2 %vm140_vm5, %v128_v45 }
  0xa9   :  { %v119_v48 = vsel %vm118_vm8, %v226_v34, %v115_v46 }
  0xaa   :  { %v124_v49 = vsel %vm121_vm9, %v123_v47, %v119_v48 }
  0xab   :  { %v127_v51 = vmul.f32 %v124_v49, %v58_v20 }
  0xad   :  { %v129_v52 = vmul.f32 %v127_v51, %v85_v50 }
  0xaf   :  { %206 = vmatmul.msk.f32.vlgmr.msra.gmra.mxu3 %vm140_vm5, %v129_v52 }
 0x12a   :  { %v164_v54 = vpop.f32.mrf.mxu2 }
 0x12b   :  { %v170_v55 = vadd.f32 %v164_v54, %v130_v53 }
 0x12d   :  { %172 = vst.msk [vmem:[#allocation2] sm:$0xff] %vm22_vm0, %v170_v55 }
 0x132   :  { %v167_v57 = vpop.f32.mrf.mxu3 }
 0x133   :  { %v171_v58 = vadd.f32 %v167_v57, %v131_v56 }
 0x134   :  { %v177_v59 = vld [vmem:[#allocation2] sm:$0xff] }
 0x135   :  { %173 = vst.msk [vmem:[#allocation2 + $0x8] sm:$0xff] %vm22_vm0, %v171_v58 }
 0x136   :  { %179 = vst.msk [vmem:[#allocation3] sm:$0xff] %vm22_vm0, %v177_v59 }
 0x13c   :  { %v178_v60 = vld [vmem:[#allocation2 + $0x8] sm:$0xff] }
 0x13d   :  { %180 = vst.msk [vmem:[#allocation3 + $0x8] sm:$0xff] %vm22_vm0, %v178_v60 }
 0x13e   :  { %193 = dma.vmem_to_hbm [thread:$0]  %s186_s22, 256, %s188_s25, [#allocation4], %s255_s26, %s255_s26, %s256_s27  }
 0x13f   :  { %251 = dma.done.wait [#allocation4], 256  }
 0x140   :  { %252 = vsyncadd [#allocation4], 4294967040 }
 0x141   :  { %198 = vsyncpa [#allocation4], 1 }

</bundles_post_ra>
